<compile_context>
chip_gen: v5e
topology: v5e:2x2
jax: 0.10.0
libtpu: 0.0.40
codegen_flags: <defaults>
</compile_context>

<pallas_src>
import functools
import math

import jax
import jax.numpy as jnp
from jax import lax
from jax.experimental import pallas as pl
from jax.experimental.pallas import tpu as pltpu


# ----------------------------- helpers -----------------------------

def _round_up(x, m):
    return (x + m - 1) // m * m


def _fit(dim, targets=(256, 128)):
    """Largest preferred tile that evenly divides `dim`, else the full dim."""
    for t in targets:
        if dim >= t and dim % t == 0:
            return t
    return dim


def _normalize(acc, denom, out_dtype):
    """Softmax normalization: exact divide for f32 outputs (reference numerics),
    approximate EUP reciprocal only when the output is bf16 (error << bf16 ulp)."""
    if jnp.dtype(out_dtype) == jnp.dtype(jnp.bfloat16):
        return (acc * pl.reciprocal(denom, approx=True)).astype(out_dtype)
    return (acc / denom).astype(out_dtype)


# ----------------------------- tiled linear (x @ w, w pre-transposed [K, N]) ----------------

def _matmul_kernel(x_ref, w_ref, o_ref, acc_ref):
    @pl.when(pl.program_id(2) == 0)
    def _():
        acc_ref[...] = jnp.zeros_like(acc_ref)

    acc_ref[...] += jnp.dot(x_ref[...], w_ref[...], preferred_element_type=jnp.float32)

    @pl.when(pl.program_id(2) == pl.num_programs(2) - 1)
    def _():
        o_ref[...] = acc_ref[...].astype(o_ref.dtype)


def linear(x, w_kn, *, tm=256, tn=256, tk=512):
    """x: [M, K]; w_kn: [K, N] (pre-transposed at init). Returns x @ w_kn -> [M, N].
    M is padded to a tile multiple so an awkward M never forces a single full-M block."""
    M, K = x.shape
    Kw, N = w_kn.shape
    assert K == Kw
    tn = _fit(N, (tn, 128))
    tk = _fit(K, (tk, 256, 128))
    tm_eff = min(tm, _round_up(M, 8))
    Mp = _round_up(M, tm_eff)
    xp = jnp.pad(x, ((0, Mp - M), (0, 0))) if Mp != M else x
    out = pl.pallas_call(
        _matmul_kernel,
        grid=(Mp // tm_eff, N // tn, K // tk),
        in_specs=[
            pl.BlockSpec((tm_eff, tk), lambda i, j, k: (i, k)),
            pl.BlockSpec((tk, tn), lambda i, j, k: (k, j)),
        ],
        out_specs=pl.BlockSpec((tm_eff, tn), lambda i, j, k: (i, j)),
        out_shape=jax.ShapeDtypeStruct((Mp, N), x.dtype),
        scratch_shapes=[pltpu.VMEM((tm_eff, tn), jnp.float32)],
        compiler_params=pltpu.CompilerParams(
            dimension_semantics=("parallel", "parallel", "arbitrary")
        ),
    )(xp, w_kn)
    return out[:M] if Mp != M else out


# ----------------------------- flash-style full attention (GQA-fused) -----------------------------

def _flash_attn_kernel(lim_ref, q_ref, k_ref, v_ref, m_ref, o_ref,
                       m_sc, l_sc, acc_sc, *, scale, g):
    b = pl.program_id(0)
    qi = pl.program_id(2)
    ki = pl.program_id(3)
    limit = lim_ref[b, qi]                       # last kv tile with any unmasked entry (>= 0)

    @pl.when(ki == 0)
    def _():
        m_sc[...] = jnp.full_like(m_sc, -jnp.inf)
        l_sc[...] = jnp.zeros_like(l_sc)
        acc_sc[...] = jnp.zeros_like(acc_sc)

    @pl.when(ki <= limit)                        # causal/padding block skipping
    def _():
        k = k_ref[...]                           # (tk, hd) — fetched once per GQA group
        v = v_ref[...]
        masked = m_ref[...] != 0                 # (tq, tk) int8 -> bool, shared across the group
        neg = jnp.finfo(jnp.float32).min
        for hg in range(g):                      # static unroll over the GQA group
            q = q_ref[hg] * jnp.asarray(scale, q_ref.dtype)
            s = lax.dot_general(q, k, (((1,), (1,)), ((), ())),
                                preferred_element_type=jnp.float32)
            s = jnp.where(masked, neg, s)        # masked_fill with finite finfo.min (no inf-inf)
            m_prev = m_sc[hg]
            m_new = jnp.maximum(m_prev, jnp.max(s, axis=-1, keepdims=True))
            alpha = jnp.exp(m_prev - m_new)
            p = jnp.exp(s - m_new)
            l_sc[hg] = alpha * l_sc[hg] + jnp.sum(p, axis=-1, keepdims=True)
            acc_sc[hg] = alpha * acc_sc[hg] + lax.dot_general(
                p.astype(v.dtype), v, (((1,), (0,)), ((), ())),
                preferred_element_type=jnp.float32)
            m_sc[hg] = m_new

    @pl.when(ki == pl.num_programs(3) - 1)
    def _():
        # TODO(synk): fully-masked query rows normalize over the first kv tile only (reference
        # gives a uniform average over all keys); such rows are padding and discarded downstream.
        o_ref[...] = _normalize(acc_sc[...], l_sc[...], o_ref.dtype)


def full_attention_pallas(q, k, v, mask_bool, head_dim, num_kv_groups,
                          tq_targets=(256, 128), tk_targets=(256, 128)):
    """q: [bsz, nh, S, hd]; k,v: [bsz, n_kv, S, hd]; mask_bool: [bsz, S, S] (True == masked)."""
    bsz, nh, S, hd = q.shape
    g = num_kv_groups
    n_kv = nh // g
    tq = _fit(S, tq_targets)                     # v5e: prefer 128 targets
    tk = _fit(S, tk_targets)
    nq, nk = S // tq, S // tk

    # Per-(batch, q-tile): index of the last kv tile with any unmasked entry (clamped >= 0).
    blocked = mask_bool.reshape(bsz, nq, tq, nk, tk)
    any_live = jnp.any(jnp.logical_not(blocked), axis=(2, 4))            # [bsz, nq, nk]
    ki_idx = jnp.arange(nk, dtype=jnp.int32)[None, None, :]
    kv_limit = jnp.max(jnp.where(any_live, ki_idx, -1), axis=-1)
    kv_limit = jnp.maximum(kv_limit, 0).astype(jnp.int32)                # [bsz, nq]

    mask_i8 = mask_bool.astype(jnp.int8)         # 4x less mask DMA than f32

    kernel = functools.partial(_flash_attn_kernel, scale=1.0 / math.sqrt(head_dim), g=g)

    def q_map(b, h, qi, ki, lim):
        return (b, h, qi, 0)                     # axis-1 block of size g at block index h

    def kv_map(b, h, qi, ki, lim):
        return (b, h, jnp.minimum(ki, lim[b, qi]), 0)   # clamp: no DMA past the causal limit

    def m_map(b, h, qi, ki, lim):
        return (b, qi, jnp.minimum(ki, lim[b, qi]))

    grid_spec = pltpu.PrefetchScalarGridSpec(
        num_scalar_prefetch=1,
        grid=(bsz, n_kv, nq, nk),
        in_specs=[
            pl.BlockSpec((None, g, tq, hd), q_map),
            pl.BlockSpec((None, None, tk, hd), kv_map),
            pl.BlockSpec((None, None, tk, hd), kv_map),
            pl.BlockSpec((None, tq, tk), m_map),
        ],
        out_specs=pl.BlockSpec((None, g, tq, hd), q_map),
        scratch_shapes=[
            pltpu.VMEM((g, tq, 1), jnp.float32),    # running max
            pltpu.VMEM((g, tq, 1), jnp.float32),    # running sum
            pltpu.VMEM((g, tq, hd), jnp.float32),   # output accumulator
        ],
    )
    return pl.pallas_call(
        kernel,
        grid_spec=grid_spec,
        out_shape=jax.ShapeDtypeStruct((bsz, nh, S, hd), q.dtype),
        compiler_params=pltpu.CompilerParams(
            dimension_semantics=("parallel", "parallel", "parallel", "arbitrary")
        ),
    )(kv_limit, q, k, v, mask_i8)


# ----------------------------- sparse (block-local) attention -----------------------------

def _sparse_attn_kernel(q_ref, k_ref, v_ref, m_ref, o_ref, kprev, vprev, *, scale, g):
    n = pl.program_id(2)
    bl = k_ref.shape[0]

    @pl.when(n == 0)
    def _():
        # Block 0's "previous" block is fully masked anyway; zero it so the dot never sees
        # uninitialized VMEM.
        kprev[...] = jnp.zeros_like(kprev)
        vprev[...] = jnp.zeros_like(vprev)

    k_cur = k_ref[...]                           # (bl, hd) — fetched once per GQA group
    v_cur = v_ref[...]
    k_pv = kprev[...]                            # previous block carried in VMEM (no re-fetch)
    v_pv = vprev[...]
    m = m_ref[...]                               # (bl, 2*bl) int8
    masked_prev = m[:, :bl] != 0
    masked_cur = m[:, bl:] != 0
    neg = jnp.finfo(jnp.float32).min

    for hg in range(g):                          # static unroll over the GQA group
        q = q_ref[hg] * jnp.asarray(scale, q_ref.dtype)
        s_prev = lax.dot_general(q, k_pv, (((1,), (1,)), ((), ())),
                                 preferred_element_type=jnp.float32)
        s_cur = lax.dot_general(q, k_cur, (((1,), (1,)), ((), ())),
                                preferred_element_type=jnp.float32)
        s_prev = jnp.where(masked_prev, neg, s_prev)
        s_cur = jnp.where(masked_cur, neg, s_cur)
        row_max = jnp.maximum(jnp.max(s_prev, axis=-1, keepdims=True),
                              jnp.max(s_cur, axis=-1, keepdims=True))
        p_prev = jnp.exp(s_prev - row_max)
        p_cur = jnp.exp(s_cur - row_max)
        denom = (jnp.sum(p_prev, axis=-1, keepdims=True)
                 + jnp.sum(p_cur, axis=-1, keepdims=True))
        acc = lax.dot_general(p_prev.astype(v_pv.dtype), v_pv, (((1,), (0,)), ((), ())),
                              preferred_element_type=jnp.float32)
        acc = acc + lax.dot_general(p_cur.astype(v_cur.dtype), v_cur, (((1,), (0,)), ((), ())),
                                    preferred_element_type=jnp.float32)
        o_ref[hg] = _normalize(acc, denom, o_ref.dtype)

    # Carry: the current block becomes the next step's "previous" block.
    kprev[...] = k_cur
    vprev[...] = v_cur


def sparse_attention_pallas(q_blk, k_blk, v_blk, mask_i8, head_dim, num_kv_groups):
    """q_blk: [bsz, nh, nb, bl, hd]; k_blk/v_blk: [bsz, n_kv, nb, bl, hd] (un-repeated GQA);
       mask_i8: [bsz, nb, bl, 2*bl] int8 (1 == masked, broadcast over heads)."""
    bsz, nh, nb, bl, hd = q_blk.shape
    g = num_kv_groups
    n_kv = nh // g
    kernel = functools.partial(_sparse_attn_kernel, scale=1.0 / math.sqrt(head_dim), g=g)
    q_spec = pl.BlockSpec((None, g, None, bl, hd), lambda b, h, n: (b, h, n, 0, 0))
    kv_spec = pl.BlockSpec((None, None, None, bl, hd), lambda b, h, n: (b, h, n, 0, 0))
    return pl.pallas_call(
        kernel,
        grid=(bsz, n_kv, nb),                    # nb innermost: enables the prev-block carry
        in_specs=[
            q_spec,
            kv_spec,
            kv_spec,
            pl.BlockSpec((None, None, bl, 2 * bl), lambda b, h, n: (b, n, 0, 0)),
        ],
        out_specs=q_spec,
        out_shape=jax.ShapeDtypeStruct((bsz, nh, nb, bl, hd), q_blk.dtype),
        scratch_shapes=[
            pltpu.VMEM((bl, hd), k_blk.dtype),   # previous K block
            pltpu.VMEM((bl, hd), v_blk.dtype),   # previous V block
        ],
        compiler_params=pltpu.CompilerParams(
            dimension_semantics=("parallel", "parallel", "arbitrary")
        ),
    )(q_blk, k_blk, v_blk, mask_i8)


# ----------------------------- JAX glue (layout / RoPE / masks) -----------------------------

def rotary_cos_sin(seq_len, dim, theta, dtype):
    inv_freq = 1.0 / (theta ** (jnp.arange(0, dim, 2, dtype=jnp.float32) / dim))
    t = jnp.arange(seq_len, dtype=jnp.float32)
    freqs = jnp.outer(t, inv_freq)
    emb = jnp.concatenate([freqs, freqs], axis=-1)
    return jnp.cos(emb).astype(dtype), jnp.sin(emb).astype(dtype)


def rotate_half(x):
    half = x.shape[-1] // 2
    return jnp.concatenate([-x[..., half:], x[..., :half]], axis=-1)


def apply_rotary_pos_emb(q, k, cos, sin, position_ids):
    cos = cos[position_ids][:, None, :, :]  # [bsz, 1, S, hd]
    sin = sin[position_ids][:, None, :, :]
    return q * cos + rotate_half(q) * sin, k * cos + rotate_half(k) * sin


def get_local_causal_mask(block_len):
    """Sliding-window causal mask, shape [bl, 2*bl]; True == masked."""
    m = jnp.concatenate(
        [jnp.zeros((block_len, block_len + 1)), jnp.ones((block_len, block_len))], axis=-1
    )
    m = m.reshape(-1)[: block_len * block_len * 2].reshape(block_len, 2 * block_len)
    return m > 0.5


def build_local_block_mask(mask_bool, block_len):
    """mask_bool: [bsz, Sp, Sp] bool (True == masked), Sp % block_len == 0.
    Returns int8 [bsz, nb, bl, 2*bl] combining the (prev, cur) block-diagonal of the padding
    mask, the all-masked phantom prev of block 0, and the window-causal mask.  Output is
    O(S * block_len); no O(S^2) blocked intermediate beyond the input mask itself."""
    bsz, Sp, _ = mask_bool.shape
    bl = block_len
    nb = Sp // bl
    mb = mask_bool.reshape(bsz, nb, bl, nb, bl)
    idx = jnp.arange(nb)
    cur = jnp.moveaxis(mb[:, idx, :, idx, :], 0, 1)                       # [bsz, nb, bl, bl]
    prev = jnp.moveaxis(mb[:, idx, :, jnp.maximum(idx - 1, 0), :], 0, 1)  # [bsz, nb, bl, bl]
    prev = prev.at[:, 0].set(True)                                        # phantom prev of block 0
    local = jnp.concatenate([prev, cur], axis=-1)                         # [bsz, nb, bl, 2bl]
    causal = get_local_causal_mask(bl)                                    # [bl, 2bl]
    return jnp.logical_or(local, causal[None, None]).astype(jnp.int8)


# ----------------------------- Module -----------------------------

class ZebraMixAttentionPallas:
    def __init__(self, layer_id, config, key, param_dtype=jnp.float32):
        self.layer_id = layer_id
        self.hidden_size = config["hidden_size"]
        self.num_heads = config["num_attention_heads"]
        self.head_dim = self.hidden_size // self.num_heads
        self.num_key_value_heads = config["num_key_value_heads"]
        self.num_key_value_groups = self.num_heads // self.num_key_value_heads
        self.max_position_embeddings = config["max_position_embeddings"]
        self.rope_theta = config.get("rope_theta", 10000.0)
        self.block_len = config["window_size"]
        self.layer_group_size = config["layer_group_size"]
        self.self_attn_type = config["self_attn_type"]
        if self.self_attn_type == "mix":
            self.self_attn_type = (
                "full" if layer_id % self.layer_group_size == 0 else "sparse"
            )
        # TODO(synk): `self.norm_factor` is referenced but never defined in the source module's
        # __init__; assume the standard sqrt(head_dim) attention scaling.
        self.norm_factor = math.sqrt(self.head_dim)

        k1, k2, k3, k4 = jax.random.split(key, 4)
        s = 0.02
        q_w = s * jax.random.normal(k1, (self.num_heads * self.head_dim, self.hidden_size))
        k_w = s * jax.random.normal(
            k2, (self.num_key_value_heads * self.head_dim, self.hidden_size))
        v_w = s * jax.random.normal(
            k3, (self.num_key_value_heads * self.head_dim, self.hidden_size))
        o_w = s * jax.random.normal(k4, (self.hidden_size, self.num_heads * self.head_dim))
        # Weights pre-transposed [K, N]; q/k/v fused so the activations are read from HBM once.
        # Use param_dtype=jnp.bfloat16 (with bf16 hidden states) for bf16 MXU throughput.
        self.qkv_wt = jnp.concatenate(
            [q_w.T, k_w.T, v_w.T], axis=1).astype(param_dtype)   # [H, (nh + 2*nkv) * hd]
        self.o_wt = o_w.T.astype(param_dtype)                    # [nh*hd, H]

    def __call__(self, hidden_states, attention_mask, position_ids):
        bsz, q_len, _ = hidden_states.shape
        nh, nkv, hd = self.num_heads, self.num_key_value_heads, self.head_dim
        q_sz, kv_sz = nh * hd, nkv * hd

        x2d = hidden_states.reshape(bsz * q_len, self.hidden_size)
        qkv = linear(x2d, self.qkv_wt)                            # [M, q_sz + 2*kv_sz]
        q = qkv[:, :q_sz].reshape(bsz, q_len, nh, hd).transpose(0, 2, 1, 3)
        k = qkv[:, q_sz:q_sz + kv_sz].reshape(bsz, q_len, nkv, hd).transpose(0, 2, 1, 3)
        v = qkv[:, q_sz + kv_sz:].reshape(bsz, q_len, nkv, hd).transpose(0, 2, 1, 3)

        cos, sin = rotary_cos_sin(q_len, hd, self.rope_theta, hidden_states.dtype)
        q, k = apply_rotary_pos_emb(q, k, cos, sin, position_ids)
        # TODO(synk): fuse RoPE (pltpu.roll) and the head-layout transposes into the attention
        # kernels to remove the remaining XLA elementwise/transpose HBM passes.

        # Additive HF-style mask {0, finfo.min} -> boolean (True == masked); int8 in the kernels.
        # TODO(synk): a general additive bias (e.g. ALiBi) is not representable as a boolean mask.
        mask_bool = attention_mask[:, 0] < 0                      # [bsz, S, S]

        if self.self_attn_type == "full":
            attn_bh = full_attention_pallas(
                q, k, v, mask_bool, hd, self.num_key_value_groups)
            attn_out = attn_bh.transpose(0, 2, 1, 3).reshape(bsz, q_len, self.hidden_size)
        else:
            attn_out = self._sparse(q, k, v, mask_bool, bsz, q_len)

        out2d = linear(attn_out.reshape(bsz * q_len, self.hidden_size), self.o_wt)
        return out2d.reshape(bsz, q_len, self.hidden_size)

    def _sparse(self, q, k, v, mask_bool, bsz, q_len):
        bl = self.block_len
        nh, nkv, hd = self.num_heads, self.num_key_value_heads, self.head_dim
        pad = (-q_len) % bl
        if pad:
            q = jnp.pad(q, ((0, 0), (0, 0), (0, pad), (0, 0)))
            k = jnp.pad(k, ((0, 0), (0, 0), (0, pad), (0, 0)))
            v = jnp.pad(v, ((0, 0), (0, 0), (0, pad), (0, 0)))
            mask_bool = jnp.pad(
                mask_bool, ((0, 0), (0, pad), (0, pad)), constant_values=True)
        Sp = q_len + pad
        nb = Sp // bl
        q_blk = q.reshape(bsz, nh, nb, bl, hd)
        k_blk = k.reshape(bsz, nkv, nb, bl, hd)
        v_blk = v.reshape(bsz, nkv, nb, bl, hd)

        mask_i8 = build_local_block_mask(mask_bool, bl)           # [bsz, nb, bl, 2bl] int8

        out = sparse_attention_pallas(
            q_blk, k_blk, v_blk, mask_i8, hd, self.num_key_value_groups)
        out = out.transpose(0, 2, 3, 1, 4).reshape(bsz, Sp, nh * hd)
        return out[:, :q_len]


# ----------------------------- Main -----------------------------

if __name__ == "__main__":
    config = dict(
        hidden_size=32,
        num_attention_heads=4,
        num_key_value_heads=2,
        max_position_embeddings=64,
        rope_theta=10000.0,
        self_attn_type="mix",
        window_size=8,      # block_len
        layer_group_size=4,
    )
    bsz, seq = 2, 16
    key = jax.random.PRNGKey(0)
    k_h, k_w0, k_w1 = jax.random.split(key, 3)

    hidden_states = jax.random.normal(
        k_h, (bsz, seq, config["hidden_size"]), dtype=jnp.float32)
    neg = float(jnp.finfo(jnp.float32).min)
    causal_bool = jnp.triu(jnp.ones((seq, seq), dtype=bool), k=1)
    attention_mask = jnp.where(causal_bool, neg, 0.0).astype(jnp.float32)[None, None]
    attention_mask = jnp.broadcast_to(attention_mask, (bsz, 1, seq, seq))
    position_ids = jnp.broadcast_to(jnp.arange(seq, dtype=jnp.int32)[None, :], (bsz, seq))

    # layer 0 -> 'full' attention path; layer 1 -> 'sparse' (block-local) path
    attn_full = ZebraMixAttentionPallas(layer_id=0, config=config, key=k_w0)
    attn_sparse = ZebraMixAttentionPallas(layer_id=1, config=config, key=k_w1)

    out_full = attn_full(hidden_states, attention_mask, position_ids)
    out_sparse = attn_sparse(hidden_states, attention_mask, position_ids)
    jax.block_until_ready(out_full)
    jax.block_until_ready(out_sparse)

    assert out_full.shape == (bsz, seq, config["hidden_size"])
    assert out_sparse.shape == (bsz, seq, config["hidden_size"])
    assert bool(jnp.all(jnp.isfinite(out_full))) and bool(jnp.all(jnp.isfinite(out_sparse)))
    print("KERNEL_OK")
</pallas_src>

<mosaic_0001>
module attributes {stable_mosaic.version = 11 : i64} {
  func.func @_matmul_kernel(%arg0: i32, %arg1: i32, %arg2: i32, %arg3: memref<32x32xf32, #tpu.memory_space<vmem>>, %arg4: memref<32x64xf32, #tpu.memory_space<vmem>>, %arg5: memref<32x64xf32, #tpu.memory_space<vmem>>, %arg6: memref<32x64xf32, #tpu.memory_space<vmem>>) attributes {dimension_semantics = [#tpu.dimension_semantics<parallel>, #tpu.dimension_semantics<parallel>, #tpu.dimension_semantics<arbitrary>], iteration_bounds = array<i64: 1, 1, 1>, scalar_prefetch = 0 : i64, scratch_operands = 1 : i64, tpu.core_type = #tpu.core_type<tc>, window_params = [{transform_indices = @transform_0, window_bounds = array<i64: 32, 32>}, {transform_indices = @transform_1, window_bounds = array<i64: 32, 64>}, {transform_indices = @transform_2, window_bounds = array<i64: 32, 64>}]} {
    %c0_i32 = arith.constant 0 : i32
    %0 = arith.cmpi eq, %arg2, %c0_i32 : i32
    %1 = arith.extui %0 : i1 to i32
    %c0_i32_0 = arith.constant 0 : i32
    %2 = arith.cmpi ne, %1, %c0_i32_0 : i32
    scf.if %2 {
      %cst_10 = arith.constant 0.000000e+00 : f32
      %12 = vector.broadcast %cst_10 : f32 to vector<32x64xf32>
      %c0_11 = arith.constant 0 : index
      %c0_12 = arith.constant 0 : index
      %13 = vector.load %arg6[%c0_11, %c0_12] : memref<32x64xf32, #tpu.memory_space<vmem>>, vector<32x64xf32>
      tpu.vector_store %arg6[%c0_11, %c0_12], %12 {strides = array<i32>} : memref<32x64xf32, #tpu.memory_space<vmem>>, vector<32x64xf32>,
    } else {
    }
    %c0 = arith.constant 0 : index
    %c0_1 = arith.constant 0 : index
    %3 = vector.load %arg6[%c0, %c0_1] : memref<32x64xf32, #tpu.memory_space<vmem>>, vector<32x64xf32>
    %c0_2 = arith.constant 0 : index
    %c0_3 = arith.constant 0 : index
    %4 = vector.load %arg3[%c0_2, %c0_3] : memref<32x32xf32, #tpu.memory_space<vmem>>, vector<32x32xf32>
    %c0_4 = arith.constant 0 : index
    %c0_5 = arith.constant 0 : index
    %5 = vector.load %arg4[%c0_4, %c0_5] : memref<32x64xf32, #tpu.memory_space<vmem>>, vector<32x64xf32>
    %cst = arith.constant dense<0.000000e+00> : vector<32x64xf32>
    %6 = tpu.matmul %4, %5, %cst {dimension_numbers = #tpu.dot_dimension_numbers<[1], [0], [0], [1], [0, 0, 1, 1], [], []>} : vector<32x32xf32>, vector<32x64xf32>, vector<32x64xf32> -> vector<32x64xf32>
    %7 = arith.addf %3, %6 : vector<32x64xf32>
    %c0_6 = arith.constant 0 : index
    %c0_7 = arith.constant 0 : index
    %8 = vector.load %arg6[%c0_6, %c0_7] : memref<32x64xf32, #tpu.memory_space<vmem>>, vector<32x64xf32>
    tpu.vector_store %arg6[%c0_6, %c0_7], %7 {strides = array<i32>} : memref<32x64xf32, #tpu.memory_space<vmem>>, vector<32x64xf32>,
    %c0_i32_8 = arith.constant 0 : i32
    %9 = arith.cmpi eq, %arg2, %c0_i32_8 : i32
    %10 = arith.extui %9 : i1 to i32
    %c0_i32_9 = arith.constant 0 : i32
    %11 = arith.cmpi ne, %10, %c0_i32_9 : i32
    scf.if %11 {
      %c0_10 = arith.constant 0 : index
      %c0_11 = arith.constant 0 : index
      %12 = vector.load %arg6[%c0_10, %c0_11] : memref<32x64xf32, #tpu.memory_space<vmem>>, vector<32x64xf32>
      %c0_12 = arith.constant 0 : index
      %c0_13 = arith.constant 0 : index
      %13 = vector.load %arg5[%c0_12, %c0_13] : memref<32x64xf32, #tpu.memory_space<vmem>>, vector<32x64xf32>
      tpu.vector_store %arg5[%c0_12, %c0_13], %12 {strides = array<i32>} : memref<32x64xf32, #tpu.memory_space<vmem>>, vector<32x64xf32>,
    } else {
    }
    return
  }
  func.func @transform_0(%arg0: i32, %arg1: i32, %arg2: i32) -> (i32, i32) {
    %c0_i32 = arith.constant 0 : i32
    return %arg0, %arg2 : i32, i32
  }
  func.func @transform_1(%arg0: i32, %arg1: i32, %arg2: i32) -> (i32, i32) {
    %c0_i32 = arith.constant 0 : i32
    return %arg2, %arg1 : i32, i32
  }
  func.func @transform_2(%arg0: i32, %arg1: i32, %arg2: i32) -> (i32, i32) {
    %c0_i32 = arith.constant 0 : i32
    return %arg0, %arg1 : i32, i32
  }
}

</mosaic_0001>

<bundles_post_ra>
// kernel: tpu_custom_call.1
= control target key start
LH: loop header
LB: loop body
LE: loop exit
PB: predicated region body
PF: predicated region fallthrough
CT: control target
= control target key end

     0   :  { %7 = vsyncpa [#allocation4], 0  ;;  %s298_s0 = inlined_call_operand.hbm [shape: f32[32,32], index: 0, kind: input, shape index: {}]   ;;  %s299_s1 = inlined_call_operand.hbm [shape: f32[32,64], index: 1, kind: input, shape index: {}]   ;;  %s300_s2 = inlined_call_operand.hbm [shape: f32[32,64], index: 2, kind: output, shape index: {}]  }
   0x1   :  { %8 = vsyncpa [#allocation7], 0 }
   0x2   :  { %9 = vsyncpa [#allocation5], 0  ;;  %s14_s11 = sshll.u32 %s298_s0, 4  ;;  %s247_s12 = smov [#allocation3]   ;;  %s15_s11 = int_to_ptr.hbm [resolvable:$true] %s14_s11 }
   0x3   :  { %s16_s13 = sshll.u32 %s247_s12, 4  ;;  %s27_s16 = sshll.u32 %s299_s1, 4  ;;  %s17_s13 = int_to_ptr.vmem [resolvable:$true] %s16_s13  ;;  %s28_s16 = int_to_ptr.hbm [resolvable:$true] %s27_s16 }
   0x4   :  { %s248_s17 = smov 128   ;;  %s249_s18 = smov 8  }
   0x5   :  { %22 = dma.hbm_to_vmem [thread:$0]  %s15_s11, 512, %s17_s13, [#allocation4], %s248_s17, %s248_s17, %s249_s18  }
   0x6   :  { %s250_s19 = smov [#allocation6]  }
   0x7   :  { %s29_s20 = sshll.u32 %s250_s19, 4  ;;  %s30_s20 = int_to_ptr.vmem [resolvable:$true] %s29_s20 }
   0x8   :  { %35 = dma.hbm_to_vmem [thread:$0]  %s28_s16, 512, %s30_s20, [#allocation7], %s248_s17, %s248_s17, %s249_s18  }
   0x9   :  { %241 = dma.done.wait [#allocation4], 512  }
   0xa   :  { %242 = vsyncadd [#allocation4], 4294966784 }
   0xb   :  { %243 = dma.done.wait [#allocation7], 512  }
   0xc   :  { %244 = vsyncadd [#allocation7], 4294966784  ;;  %vm48_vm0 = vcmask 523264   ;;  %v251_v0 = vmov 0.0   ;;  %v64_v1 = vld [vmem:[#allocation6 + $0x18] sm:$0xff]  ;;  %v63_v2 = vld [vmem:[#allocation6 + $0x10] sm:$0xff] }
   0xd   :  { %49 = vst.msk [vmem:[#allocation2] sm:$0xff] %vm48_vm0, %v251_v0  ;;  %152 = vmatpush.msra.mxu2 %v64_v1  ;;  %153 = vmatpush.msra.mxu3 %v64_v1  ;;  %v62_v3 = vld [vmem:[#allocation6 + $0x8] sm:$0xff]  ;;  %v61_v4 = vld [vmem:[#allocation6] sm:$0xff]  ;;  %v59_v5 = vld [vmem:[#allocation3 + $0x10] sm:$0xff]  ;;  %vm65_vm1 = vcmask 261120   ;;  %s252_s0 = smov [#allocation8]  }
   0xe   :  { %50 = vst.msk [vmem:[#allocation2 + $0x8] sm:$0xff] %vm48_vm0, %v251_v0  ;;  %90 = vmatpush.msra.mxu0 %v64_v1  ;;  %151 = vmatpush.msra.mxu1 %v64_v1  ;;  %v60_v6 = vld [vmem:[#allocation3 + $0x18] sm:$0xff]  ;;  %v57_v7 = vld [vmem:[#allocation3] sm:$0xff]  ;;  %v58_v8 = vld [vmem:[#allocation3 + $0x8] sm:$0xff]  ;;  %s131_s1 = sshll.u32 %s252_s0, 4  ;;  %s133_s23 = sshll.u32 %s300_s2, 4  ;;  %s132_s1 = int_to_ptr.vmem [resolvable:$true] %s131_s1  ;;  %s134_s23 = int_to_ptr.hbm [resolvable:$true] %s133_s23 }
   0xf   :  { %51 = vst.msk [vmem:[#allocation2 + $0x10] sm:$0xff] %vm48_vm0, %v251_v0  ;;  %155 = vmatpush.msra.mxu2 %v63_v2  ;;  %156 = vmatpush.msra.mxu3 %v63_v2 }
  0x10   :  { %52 = vst.msk [vmem:[#allocation2 + $0x18] sm:$0xff] %vm48_vm0, %v251_v0  ;;  %91 = vmatpush.msra.mxu0 %v63_v2  ;;  %154 = vmatpush.msra.mxu1 %v63_v2 }
  0x11   :  { %158 = vmatpush.msra.mxu2 %v62_v3  ;;  %159 = vmatpush.msra.mxu3 %v62_v3 }
  0x12   :  { %92 = vmatpush.msra.mxu0 %v62_v3  ;;  %157 = vmatpush.msra.mxu1 %v62_v3 }
  0x13   :  { %161 = vmatpush.msra.mxu2 %v61_v4  ;;  %162 = vmatpush.msra.mxu3 %v61_v4 }
  0x14   :  { %149 = vmatmul.msk.f32.vlgmr.msra.gmra.mxu2 %vm65_vm1, %v59_v5  ;;  %150 = vmatmul.msk.f32.vlgmr.msra.gmra.mxu3 %vm65_vm1, %v60_v6  ;;  %v53_v9 = vld [vmem:[#allocation2] sm:$0xff] }
  0x15   :  { %93 = vmatpush.msra.mxu0 %v61_v4  ;;  %160 = vmatpush.msra.mxu1 %v61_v4  ;;  %v54_v10 = vld [vmem:[#allocation2 + $0x8] sm:$0xff] }
  0x16   :  { %147 = vmatmul.msk.f32.vlgmr.msra.gmra.mxu0 %vm65_vm1, %v57_v7  ;;  %148 = vmatmul.msk.f32.vlgmr.msra.gmra.mxu1 %vm65_vm1, %v58_v8  ;;  %v55_v15 = vld [vmem:[#allocation2 + $0x10] sm:$0xff] }
  0x17   :  { %v56_v16 = vld [vmem:[#allocation2 + $0x18] sm:$0xff] }
  0x93   :  { %v95_v11 = vpop.f32.mrf.mxu0  ;;  %v98_v12 = vpop.f32.mrf.mxu1 }
  0x94   :  { %v107_v13 = vadd.f32 %v95_v11, %v53_v9  ;;  %v108_v14 = vadd.f32 %v98_v12, %v54_v10 }
  0x96   :  { %112 = vst.msk [vmem:[#allocation2] sm:$0xff] %vm48_vm0, %v107_v13 }
  0x97   :  { %113 = vst.msk [vmem:[#allocation2 + $0x8] sm:$0xff] %vm48_vm0, %v108_v14  ;;  %v101_v17 = vpop.f32.mrf.mxu2  ;;  %v104_v18 = vpop.f32.mrf.mxu3 }
  0x98   :  { %v109_v19 = vadd.f32 %v101_v17, %v55_v15  ;;  %v110_v20 = vadd.f32 %v104_v18, %v56_v16 }
  0x9a   :  { %114 = vst.msk [vmem:[#allocation2 + $0x10] sm:$0xff] %vm48_vm0, %v109_v19 }
  0x9b   :  { %115 = vst.msk [vmem:[#allocation2 + $0x18] sm:$0xff] %vm48_vm0, %v110_v20 }
  0x9d   :  { %v119_v21 = vld [vmem:[#allocation2] sm:$0xff] }
  0x9e   :  { %v120_v22 = vld [vmem:[#allocation2 + $0x8] sm:$0xff]  ;;  %123 = vst.msk [vmem:[#allocation8] sm:$0xff] %vm48_vm0, %v119_v21 }
  0x9f   :  { %124 = vst.msk [vmem:[#allocation8 + $0x8] sm:$0xff] %vm48_vm0, %v120_v22 }
  0xa1   :  { %v121_v23 = vld [vmem:[#allocation2 + $0x10] sm:$0xff] }
  0xa2   :  { %v122_v24 = vld [vmem:[#allocation2 + $0x18] sm:$0xff]  ;;  %125 = vst.msk [vmem:[#allocation8 + $0x10] sm:$0xff] %vm48_vm0, %v121_v23 }
  0xa3   :  { %126 = vst.msk [vmem:[#allocation8 + $0x18] sm:$0xff] %vm48_vm0, %v122_v24 }
  0xa4   :  { %139 = dma.vmem_to_hbm [thread:$0]  %s132_s1, 512, %s134_s23, [#allocation5], %s248_s17, %s248_s17, %s249_s18  }
  0xa5   :  { %245 = dma.done.wait [#allocation5], 512  }
  0xa6   :  { %246 = vsyncadd [#allocation5], 4294966784 }
  0xa7   :  { %144 = vsyncpa [#allocation4], 1 }
  0xa8   :  { %145 = vsyncpa [#allocation7], 1 }
  0xa9   :  { %146 = vsyncpa [#allocation5], 1 }

</bundles_post_ra>
